<compile_context>
chip_gen: v7x
topology: tpu7x:2x2x1
jax: 0.10.0
libtpu: 0.0.40
codegen_flags: <defaults>
</compile_context>

<pallas_src>
import jax
import jax.numpy as jnp
from jax.experimental import pallas as pl
from jax.experimental.pallas import tpu as pltpu

N_FEATURES = 5


def net_kernel(wb_ref, x_ref, o_ref):
    """out[0, :] = sum_f wb[f] * x[f, :] + wb[5].

    wb_ref: (6,)      SMEM: [w0..w4, bias]  (collapsed affine map)
    x_ref : (5, TB)   VMEM: feature-major batch tile
    o_ref : (1, TB)   VMEM: lane-dense output tile
    """
    x = x_ref[...]                                                  # (5, TB) f32
    acc = jnp.full(o_ref.shape, wb_ref[N_FEATURES], dtype=jnp.float32)  # bias
    for f in range(N_FEATURES):                                     # 5 unrolled VPU FMAs
        acc = acc + wb_ref[f] * x[f:f + 1, :]
    o_ref[...] = acc.astype(o_ref.dtype)


def net_forward(x, params, *, tb=2048):
    """x: (B, 5) float32 -> (B, 1) float32. params: (in,out) weights, (1,out) biases."""
    w1, b1 = params["w1"], params["b1"]   # (5,5), (1,5)
    w2, b2 = params["w2"], params["b2"]   # (5,5), (1,5)
    w3, b3 = params["w3"], params["b3"]   # (5,1), (1,1)

    # Collapse fc1->fc2->fc1->fc2->fc3 into one affine map (tiny one-time cost,
    # handled by XLA outside the kernel hot path).
    w_eff = w1 @ w2 @ w1 @ w2 @ w3                                  # (5, 1)
    b_eff = ((((b1 @ w2 + b2) @ w1 + b1) @ w2 + b2) @ w3 + b3)      # (1, 1)
    wb = jnp.concatenate([w_eff[:, 0], b_eff[0]], axis=0)           # (6,) weights+bias

    B, F = x.shape
    assert F == N_FEATURES, x.shape

    # Feature-major layout for lane-dense blocks.
    # TODO(synk): if the producer can emit x already as (5, B), drop this
    # transpose — it costs one extra HBM pass over x at very large B.
    x_t = x.T                                                       # (5, B)

    # Clamp the tile to the 128-rounded batch so tiny batches are one partial
    # block; otherwise keep the big tile (low per-step overhead, near roofline).
    tb_eff = min(tb, pl.cdiv(B, 128) * 128)
    grid = (pl.cdiv(B, tb_eff),)

    out = pl.pallas_call(
        net_kernel,
        out_shape=jax.ShapeDtypeStruct((1, B), x.dtype),
        grid_spec=pl.GridSpec(
            grid=grid,
            in_specs=[
                # Merged collapsed weights + bias, resident in SMEM.
                pl.BlockSpec(memory_space=pltpu.MemorySpace.SMEM),
                # Streamed feature-major batch tile.
                pl.BlockSpec((F, tb_eff), lambda i: (0, i)),
            ],
            # Lane-dense output tile (unmasked full-lane stores).
            out_specs=pl.BlockSpec((1, tb_eff), lambda i: (0, i)),
        ),
        compiler_params=pltpu.CompilerParams(
            dimension_semantics=("parallel",),       # batch axis shards across TCs (v7x)
            vmem_limit_bytes=32 * 1024 * 1024,
        ),
        cost_estimate=pl.CostEstimate(
            flops=10 * B,                             # 5 mul + 5 add per row
            transcendentals=0,
            bytes_accessed=24 * B + 4 * B,            # read x (20B/row rounded) + write out
        ),
    )(wb, x_t)
    return out.reshape(B, 1)


def init_params(key):
    """Deterministic init mimicking nn.Linear default (uniform(-1/sqrt(fan_in), ...))."""
    def linear(key, fan_in, fan_out):
        kw, kb = jax.random.split(key)
        bound = 1.0 / jnp.sqrt(jnp.float32(fan_in))
        # PyTorch stores weight as (out, in); transpose to (in, out) here (glue).
        w_oi = jax.random.uniform(kw, (fan_out, fan_in), jnp.float32, -bound, bound)
        b = jax.random.uniform(kb, (1, fan_out), jnp.float32, -bound, bound)
        return w_oi.T, b

    k1, k2, k3 = jax.random.split(key, 3)
    w1, b1 = linear(k1, 5, 5)
    w2, b2 = linear(k2, 5, 5)
    w3, b3 = linear(k3, 5, 1)
    return {"w1": w1, "b1": b1, "w2": w2, "b2": b2, "w3": w3, "b3": b3}


def net_forward_ref(x, p):
    """Pure-JAX reference with the original un-collapsed layer chain."""
    h = x @ p["w1"] + p["b1"]
    h = h @ p["w2"] + p["b2"]
    h = h @ p["w1"] + p["b1"]
    h = h @ p["w2"] + p["b2"]
    return h @ p["w3"] + p["b3"]


if __name__ == "__main__":
    key = jax.random.PRNGKey(0)
    kx, kp = jax.random.split(key)
    params = init_params(kp)

    # Tiny-batch case from the original test: single partial block (B=8 < 128).
    x_small = jax.random.normal(kx, (8, 5), jnp.float32)
    out_small = jax.block_until_ready(net_forward(x_small, params))
    ref_small = net_forward_ref(x_small, params)
    assert out_small.shape == (8, 1), out_small.shape
    assert jnp.allclose(out_small, ref_small, atol=1e-5, rtol=1e-4), (out_small, ref_small)

    # Multi-step grid + partial final block (B=300, tb=128 -> 3 steps, last masked).
    x_big = jax.random.normal(kx, (300, 5), jnp.float32)
    out_big = jax.block_until_ready(net_forward(x_big, params, tb=128))
    ref_big = net_forward_ref(x_big, params)
    assert out_big.shape == (300, 1), out_big.shape
    assert jnp.allclose(out_big, ref_big, atol=1e-5, rtol=1e-4), (out_big, ref_big)

    print("KERNEL_OK")
</pallas_src>

<mosaic_0001>
module attributes {stable_mosaic.version = 11 : i64} {
  func.func @net_kernel(%arg0: i32, %arg1: memref<6xf32, #tpu.memory_space<smem>>, %arg2: memref<5x128xf32, #tpu.memory_space<vmem>>, %arg3: memref<1x128xf32, #tpu.memory_space<vmem>>) attributes {dimension_semantics = [#tpu.dimension_semantics<parallel>], iteration_bounds = array<i64: 1>, scalar_prefetch = 0 : i64, scratch_operands = 0 : i64, tpu.core_type = #tpu.core_type<tc>, window_params = [{transform_indices = @transform_0, window_bounds = array<i64: 6>}, {transform_indices = @transform_1, window_bounds = array<i64: 5, 128>}, {transform_indices = @transform_2, window_bounds = array<i64: 1, 128>}]} {
    %c0 = arith.constant 0 : index
    %c0_0 = arith.constant 0 : index
    %0 = vector.load %arg2[%c0, %c0_0] : memref<5x128xf32, #tpu.memory_space<vmem>>, vector<5x128xf32>
    %c5 = arith.constant 5 : index
    %1 = memref.load %arg1[%c5] : memref<6xf32, #tpu.memory_space<smem>>
    %2 = vector.broadcast %1 : f32 to vector<1x128xf32>
    %c0_1 = arith.constant 0 : index
    %3 = memref.load %arg1[%c0_1] : memref<6xf32, #tpu.memory_space<smem>>
    %4 = vector.extract_strided_slice %0 {offsets = [0, 0], sizes = [1, 128], strides = [1, 1]} : vector<5x128xf32> to vector<1x128xf32>
    %5 = vector.broadcast %3 : f32 to vector<1x128xf32>
    %6 = arith.mulf %5, %4 : vector<1x128xf32>
    %7 = arith.addf %2, %6 : vector<1x128xf32>
    %c1 = arith.constant 1 : index
    %8 = memref.load %arg1[%c1] : memref<6xf32, #tpu.memory_space<smem>>
    %9 = vector.extract_strided_slice %0 {offsets = [1, 0], sizes = [1, 128], strides = [1, 1]} : vector<5x128xf32> to vector<1x128xf32>
    %10 = vector.broadcast %8 : f32 to vector<1x128xf32>
    %11 = arith.mulf %10, %9 : vector<1x128xf32>
    %12 = arith.addf %7, %11 : vector<1x128xf32>
    %c2 = arith.constant 2 : index
    %13 = memref.load %arg1[%c2] : memref<6xf32, #tpu.memory_space<smem>>
    %14 = vector.extract_strided_slice %0 {offsets = [2, 0], sizes = [1, 128], strides = [1, 1]} : vector<5x128xf32> to vector<1x128xf32>
    %15 = vector.broadcast %13 : f32 to vector<1x128xf32>
    %16 = arith.mulf %15, %14 : vector<1x128xf32>
    %17 = arith.addf %12, %16 : vector<1x128xf32>
    %c3 = arith.constant 3 : index
    %18 = memref.load %arg1[%c3] : memref<6xf32, #tpu.memory_space<smem>>
    %19 = vector.extract_strided_slice %0 {offsets = [3, 0], sizes = [1, 128], strides = [1, 1]} : vector<5x128xf32> to vector<1x128xf32>
    %20 = vector.broadcast %18 : f32 to vector<1x128xf32>
    %21 = arith.mulf %20, %19 : vector<1x128xf32>
    %22 = arith.addf %17, %21 : vector<1x128xf32>
    %c4 = arith.constant 4 : index
    %23 = memref.load %arg1[%c4] : memref<6xf32, #tpu.memory_space<smem>>
    %24 = vector.extract_strided_slice %0 {offsets = [4, 0], sizes = [1, 128], strides = [1, 1]} : vector<5x128xf32> to vector<1x128xf32>
    %25 = vector.broadcast %23 : f32 to vector<1x128xf32>
    %26 = arith.mulf %25, %24 : vector<1x128xf32>
    %27 = arith.addf %22, %26 : vector<1x128xf32>
    %c0_2 = arith.constant 0 : index
    %c0_3 = arith.constant 0 : index
    %28 = vector.load %arg3[%c0_2, %c0_3] : memref<1x128xf32, #tpu.memory_space<vmem>>, vector<1x128xf32>
    tpu.vector_store %arg3[%c0_2, %c0_3], %27 {strides = array<i32>} : memref<1x128xf32, #tpu.memory_space<vmem>>, vector<1x128xf32>,
    return
  }
  func.func @transform_0(%arg0: i32) -> i32 {
    %c0_i32 = arith.constant 0 : i32
    %c0_i32_0 = arith.constant 0 : i32
    return %c0_i32 : i32
  }
  func.func @transform_1(%arg0: i32) -> (i32, i32) {
    %c0_i32 = arith.constant 0 : i32
    %c0_i32_0 = arith.constant 0 : i32
    return %c0_i32, %arg0 : i32, i32
  }
  func.func @transform_2(%arg0: i32) -> (i32, i32) {
    %c0_i32 = arith.constant 0 : i32
    %c0_i32_0 = arith.constant 0 : i32
    return %c0_i32, %arg0 : i32, i32
  }
}

</mosaic_0001>

<bundles_post_ra>
// kernel: tpu_custom_call.1
= control target key start
LH: loop header
LB: loop body
LE: loop exit
PB: predicated region body
PF: predicated region fallthrough
CT: control target
= control target key end

     0   :  { %7 = vsyncpa [#allocation5], 0  ;;  %s209_s0 = inlined_call_operand.hbm [shape: f32[6], index: 0, kind: input, shape index: {}]   ;;  %s210_s1 = inlined_call_operand.hbm [shape: f32[5,8], index: 1, kind: input, shape index: {}]   ;;  %s211_s2 = inlined_call_operand.hbm [shape: f32[1,8], index: 2, kind: output, shape index: {}]  }
   0x1   :  { %8 = vsyncpa [#allocation3], 0 }
   0x2   :  { %9 = vsyncpa [#allocation4], 0  ;;  %s95_s11 = scalar_lea.hbm %s209_s0, 16 }
   0x3   :  { %p96_p0 = scmp.ne.s32.totalorder %s209_s0, %s95_s11  ;;  %p99_p1 = scmp.lt.u32.totalorder %s95_s11, %s209_s0 }
   0x5   :  { %p101_p2 = pnand %p99_p1, %p96_p0 }
   0x7   :  { %104 = shalt.err (!%p101_p2)
}
   0x8   :  { %s155_s16 = smov [#allocation2]   ;;  %s156_s19 = smov [#allocation6]  }
   0x9   :  { %17 = dma.hbm_to_smem %s209_s0, 16, %s155_s16, [#allocation5]  }
   0xa   :  { %s24_s20 = sshll.u32 %s156_s19, 4  ;;  %s105_s23 = scalar_lea.hbm %s210_s1, 128  ;;  %s25_s20 = int_to_ptr.vmem [resolvable:$true] %s24_s20 }
   0xb   :  { %p106_p3 = scmp.ne.s32.totalorder %s210_s1, %s105_s23  ;;  %p109_p4 = scmp.lt.u32.totalorder %s105_s23, %s210_s1 }
   0xd   :  { %p111_p5 = pnand %p109_p4, %p106_p3 }
   0xf   :  { %114 = shalt.err (!%p111_p5)
}
  0x10   :  { %s115_s28 = scalar_lea.vmem %s25_s20, 128  ;;  %p120_p7 = scmp.lt.s32.totalorder %s25_s20, %s25_s20 }
  0x11   :  { %p116_p6 = scmp.ne.s32.totalorder %s25_s20, %s115_s28  ;;  %p121_p8 = scmp.lt.s32.totalorder %s115_s28, %s115_s28 }
  0x13   :  { %p122_p9 = por %p121_p8, %p120_p7 }
  0x15   :  { %p123_p10 = pnand %p122_p9, %p116_p6 }
  0x17   :  { %126 = shalt.err (!%p123_p10)
}
  0x18   :  { %27 = dma.hbm_to_vmem [thread:$0]  %s210_s1, 128, %s25_s20, [#allocation3]  }
  0x19   :  { %149 = dma.done.wait [#allocation5], 16  }
  0x1a   :  { %150 = vsyncadd [#allocation5], 4294967280 }
  0x1b   :  { %151 = dma.done.wait [#allocation3], 128  }
  0x1c   :  { %152 = vsyncadd [#allocation3], 4294967168 }
  0x1d   :  { %34 = sfence }
  0x1e   :  { %s87_s30 = sld [smem:[#allocation2 + $0x5]]  ;;  %s38_s3 = sld [smem:[#allocation2]]  ;;  %v35_v0 = vld [vmem:[#allocation6] sm:$0x1f] }
  0x1f   :  { %s88_s4 = sld [smem:[#allocation2 + $0x1]]  ;;  %s89_s5 = sld [smem:[#allocation2 + $0x2]] }
  0x20   :  { %s90_s6 = sld [smem:[#allocation2 + $0x3]]  ;;  %s91_s7 = sld [smem:[#allocation2 + $0x4]] }
  0x21   :  { %s157_s1 = smov [#allocation7]  }
  0x22   :  { %s77_s8 = sshll.u32 %s157_s1, 4  ;;  %s78_s8 = int_to_ptr.vmem [resolvable:$true] %s77_s8 }
  0x23   :  { %s127_s9 = scalar_lea.vmem %s78_s8, 16  ;;  %s131_s10 = scalar_lea.vmem %s78_s8, 32 }
  0x24   :  { %v37_v1 = vstv %s87_s30  ;;  %v39_v2 = vstv %s38_s3  ;;  %p128_p11 = scmp.ne.s32.totalorder %s78_s8, %s127_s9  ;;  %p132_p12 = scmp.lt.s32.totalorder %s78_s8, %s78_s8 }
  0x25   :  { %v40_v3 = vmul.f32 %v39_v2, %v35_v0  ;;  %v43_v4 = vstv %s88_s4  ;;  %v50_v5 = vstv %s89_s5  ;;  %p133_p13 = scmp.lt.s32.totalorder %s131_s10, %s127_s9 }
  0x26   :  { %v44_v6 = vmul.f32 %v43_v4, %v35_v0  ;;  %v51_v7 = vmul.f32 %v50_v5, %v35_v0  ;;  %v57_v8 = vstv %s90_s6  ;;  %v64_v9 = vstv %s91_s7 }
  0x27   :  { %v41_v10 = vadd.f32 %v40_v3, %v37_v1  ;;  %v58_v11 = vmul.f32 %v57_v8, %v35_v0  ;;  %v65_v14 = vmul.f32 %v64_v9, %v35_v0  ;;  %p134_p0 = por %p133_p13, %p132_p12 }
  0x28   :  { %v46_v12 = vrot.slane %v44_v6, 1  ;;  %v53_v13 = vrot.slane %v51_v7, 2 }
  0x29   :  { %v60_v16 = vrot.slane %v58_v11, 3  ;;  %v67_v18 = vrot.slane %v65_v14, 4  ;;  %p135_p1 = pnand %p134_p0, %p128_p11 }
  0x2a   :  { %v48_v15 = vadd.f32 %v46_v12, %v41_v10 }
  0x2c   :  { %v55_v17 = vadd.f32 %v53_v13, %v48_v15 }
  0x2e   :  { %v62_v19 = vadd.f32 %v60_v16, %v55_v17 }
  0x30   :  { %v69_v20 = vadd.f32 %v67_v18, %v62_v19 }
  0x32   :  { %70 = vst [vmem:[#allocation7] sm:$0x1] %v69_v20 }
  0x33   :  { %138 = shalt.err (!%p135_p1)
}
  0x34   :  { %s139_s13 = scalar_lea.hbm %s211_s2, 16 }
  0x35   :  { %p140_p2 = scmp.ne.s32.totalorder %s211_s2, %s139_s13  ;;  %p143_p3 = scmp.lt.u32.totalorder %s139_s13, %s211_s2 }
  0x37   :  { %p145_p4 = pnand %p143_p3, %p140_p2 }
  0x39   :  { %148 = shalt.err (!%p145_p4)
}
  0x3a   :  { %80 = dma.vmem_to_hbm [thread:$0]  %s78_s8, 16, %s211_s2, [#allocation4]  }
  0x3b   :  { %153 = dma.done.wait [#allocation4], 16  }
  0x3c   :  { %154 = vsyncadd [#allocation4], 4294967280 }
  0x3d   :  { %84 = vsyncpa [#allocation3], 1 }
  0x3e   :  { %85 = vsyncpa [#allocation4], 1 }
  0x3f   :  { %86 = vsyncpa [#allocation5], 1 }

</bundles_post_ra>
